<compile_context>
chip_gen: v6e
topology: v6e:2x2x1
jax: 0.10.0
libtpu: 0.0.40
codegen_flags: <defaults>
</compile_context>

<pallas_src>
import functools

import jax
import jax.numpy as jnp
from jax.experimental import pallas as pl
from jax.experimental.pallas import tpu as pltpu

NEG_SLOPE = 0.01  # nn.LeakyReLU default negative_slope


def _round_up(v, m):
    return (v + m - 1) // m * m


def _temporal_block_kernel(*refs, K, dilation, cout, cin, cin_r, halo_w,
                           has_halo):
    """One (batch, L-tile) grid step.

    refs (has_halo=True):  x_ref, h_ref, w_ref, b_ref, o_ref, xi_ref
    refs (has_halo=False): x_ref,        w_ref, b_ref, o_ref, xi_ref

    x_ref : (Cin, TL)          current L-tile of the NCL input
    h_ref : (Cin, HALO_W)      tail of the previous L-tile (causal halo)
    w_ref : (2*Cout, K*Cin_r)  fused [conv taps ; 1x1 downsample] weights (bf16)
    b_ref : (2*Cout, 1)        fused biases (f32)
    o_ref : (Cout, TL)         NCL output tile
    xi_ref: (K*Cin_r, TL)      bf16 causal-im2col scratch (persists across steps)
    """
    if has_halo:
        x_ref, h_ref, w_ref, b_ref, o_ref, xi_ref = refs
    else:
        x_ref, w_ref, b_ref, o_ref, xi_ref = refs
        h_ref = None

    TL = x_ref.shape[-1]
    cdt = xi_ref.dtype

    # Cast the activation tile to the MXU dtype once; every tap-slab store
    # below is then a bf16 store (halves scratch footprint and store traffic
    # vs. an f32 scratch re-cast at matmul time).
    xb = x_ref[...].astype(cdt)

    if has_halo:
        t = pl.program_id(1)
        hb = h_ref[...].astype(cdt)
        # Tile 0 has zero causal history.
        hb = jnp.where(t == 0, jnp.zeros_like(hb), hb)

    # Causal im2col: tap k multiplies the input delayed by s=(K-1-k)*dilation
    # (this folds both the left zero-pad and the Chomp). Only the causal
    # prefix [0, s) of each slab is filled from the halo / zeros; the bulk
    # [s, TL) is the shifted current tile — no full-scratch zero fill.
    for k in range(K):                          # K is small & static
        s = (K - 1 - k) * dilation
        r0 = k * cin_r
        if s == 0:
            xi_ref[r0:r0 + cin, :] = xb
        elif s < TL:
            xi_ref[r0:r0 + cin, s:] = xb[:, :TL - s]
            if has_halo:
                xi_ref[r0:r0 + cin, :s] = hb[:, halo_w - s:]
            else:
                xi_ref[r0:r0 + cin, :s] = jnp.zeros((cin, s), cdt)
        else:
            # Tap never sees in-tile data. The scratch persists across grid
            # steps, so this slab must be re-zeroed every iteration.
            xi_ref[r0:r0 + cin, :] = jnp.zeros((cin, TL), cdt)
        if cin_r > cin:
            # Rows padding Cin up to the bf16 packing granularity; the
            # matching weight columns are zero, but keep these rows finite.
            xi_ref[r0 + cin:r0 + cin_r, :] = jnp.zeros((cin_r - cin, TL), cdt)

    # Single fused MXU matmul (bf16 inputs, f32 accumulate):
    #   rows [0, Cout)      -> causal dilated conv
    #   rows [Cout, 2*Cout) -> 1x1 residual downsample
    mm = jnp.dot(w_ref[...], xi_ref[...], preferred_element_type=jnp.float32)
    mm = mm + b_ref[...]

    conv = mm[:cout, :]
    res = mm[cout:, :]
    out1 = jnp.where(conv > 0, conv, NEG_SLOPE * conv)      # LeakyReLU
    # Dropout == identity (inference).
    y = out1 + res
    o_ref[...] = jnp.where(y > 0, y, NEG_SLOPE * y).astype(o_ref.dtype)


def temporal_block(x, w1, b1, wds, bds, *, kernel_size=4, dilation=1,
                   compute_dtype=jnp.bfloat16, l_tile=512):
    """x: (N, Cin, L) float32 (PyTorch NCL). Returns (N, Cout, L).

    w1 : (Cout, Cin, K)  conv1 weight (weight_norm already applied)
    b1 : (Cout,)         conv1 bias
    wds: (Cout, Cin, 1)  1x1 downsample conv weight
    bds: (Cout,)         downsample bias
    """
    N, Cin, L = x.shape
    Cout = w1.shape[0]
    K = kernel_size
    pad = dilation * (K - 1)

    # --- L tiling: tile the sequence with a causal halo from the previous ---
    # --- tile; small L degrades to a single full-L tile (no halo).        ---
    l_tile = _round_up(max(l_tile, 128), 128)
    if L <= l_tile:
        TL, halo_w = L, 0
    else:
        TL = l_tile
        while TL < pad:            # causal history must fit in one prev tile
            TL *= 2
        if TL >= L:
            TL, halo_w = L, 0
        else:
            halo_w = 128           # smallest 128-multiple divisor of TL >= pad
            while halo_w < TL and (halo_w < pad or TL % halo_w != 0):
                halo_w *= 2
            halo_w = min(halo_w, TL)
            if TL % halo_w != 0 or halo_w < pad:
                halo_w = TL        # safe fallback: full previous tile
    has_halo = halo_w > 0
    num_tiles = pl.cdiv(L, TL)

    # --- fused weights -------------------------------------------------------
    # bf16 packs 2 rows/sublane; round Cin up to 16 so each tap slab in the
    # scratch starts on a packed-vreg boundary.
    pack = 16 if compute_dtype == jnp.bfloat16 else 8
    Cin_r = _round_up(Cin, pack)

    # Column k*Cin_r + c multiplies the input delayed by (K-1-k)*dilation, so
    # the conv block is w1 in tap-major order and the 1x1 downsample occupies
    # the last-tap (zero-delay) slot.
    w_conv = jnp.transpose(w1, (0, 2, 1))                      # (Cout, K, Cin)
    w_conv = jnp.pad(w_conv, ((0, 0), (0, 0), (0, Cin_r - Cin)))
    w_conv = w_conv.reshape(Cout, K * Cin_r)
    w_ds = jnp.zeros((Cout, K * Cin_r), w1.dtype)
    w_ds = w_ds.at[:, (K - 1) * Cin_r:(K - 1) * Cin_r + Cin].set(wds[:, :, 0])
    w_fused = jnp.concatenate([w_conv, w_ds], axis=0).astype(compute_dtype)
    b_fused = jnp.concatenate([b1, bds]).reshape(2 * Cout, 1).astype(jnp.float32)

    # --- specs ---------------------------------------------------------------
    x_spec = pl.BlockSpec((None, Cin, TL), lambda n, t: (n, 0, t))
    o_spec = pl.BlockSpec((None, Cout, TL), lambda n, t: (n, 0, t))
    # Constant index maps -> weight/bias blocks stay resident across the grid.
    w_spec = pl.BlockSpec((2 * Cout, K * Cin_r), lambda n, t: (0, 0))
    b_spec = pl.BlockSpec((2 * Cout, 1), lambda n, t: (0, 0))

    in_specs = [x_spec]
    operands = [x]
    if has_halo:
        hblk = TL // halo_w
        in_specs.append(pl.BlockSpec(
            (None, Cin, halo_w),
            lambda n, t: (n, 0, jnp.maximum(t * hblk - 1, 0))))
        operands.append(x)        # same array, read-only halo window
    in_specs += [w_spec, b_spec]
    operands += [w_fused, b_fused]

    # --- explicit scoped-VMEM budget (inputs/outputs double-buffered) --------
    itemsize = jnp.dtype(x.dtype).itemsize
    cbytes = jnp.dtype(compute_dtype).itemsize
    blk_bytes = (Cin * TL * itemsize
                 + (Cin * halo_w * itemsize if has_halo else 0)
                 + Cout * TL * itemsize
                 + 2 * Cout * K * Cin_r * cbytes
                 + 2 * Cout * 4)
    scratch_bytes = K * Cin_r * TL * cbytes
    vmem_limit = int(min(max(2 * (2 * blk_bytes + scratch_bytes), 32 * 2**20),
                         64 * 2**20))

    kernel = functools.partial(
        _temporal_block_kernel, K=K, dilation=dilation, cout=Cout, cin=Cin,
        cin_r=Cin_r, halo_w=halo_w, has_halo=has_halo)

    return pl.pallas_call(
        kernel,
        out_shape=jax.ShapeDtypeStruct((N, Cout, L), x.dtype),
        grid=(N, num_tiles),
        in_specs=in_specs,
        out_specs=o_spec,
        scratch_shapes=[pltpu.VMEM((K * Cin_r, TL), compute_dtype)],
        compiler_params=pltpu.CompilerParams(
            dimension_semantics=("parallel", "parallel"),
            vmem_limit_bytes=vmem_limit),
    )(*operands)


def _reference(x, w1, b1, wds, bds, *, kernel_size=4, dilation=1):
    """Pure-JAX f32 reference (causal dilated conv + LeakyReLU + residual)."""
    N, Cin, L = x.shape
    pad = dilation * (kernel_size - 1)
    x_nlc = jnp.transpose(x, (0, 2, 1))
    x_pad = jnp.pad(x_nlc, ((0, 0), (pad, 0), (0, 0)))
    acc = jnp.zeros((N, L, w1.shape[0]), jnp.float32)
    for k in range(kernel_size):
        xk = x_pad[:, k * dilation:k * dilation + L, :]
        acc = acc + xk @ w1[:, :, k].T
    acc = acc + b1[None, None, :]
    out1 = jnp.where(acc > 0, acc, NEG_SLOPE * acc)
    res = x_nlc @ wds[:, :, 0].T + bds[None, None, :]
    s = out1 + res
    out = jnp.where(s > 0, s, NEG_SLOPE * s)
    return jnp.transpose(out, (0, 2, 1))


if __name__ == "__main__":
    key = jax.random.PRNGKey(0)
    N, Cin, Cout = 2, 4, 8
    K = 4

    k_x, k_v1, k_g1, k_b1, k_wd, k_bd, k_x2 = jax.random.split(key, 7)

    # conv1 with weight_norm: w = g * v / ||v||_(per out-channel, dims 1&2)
    v1 = 0.01 * jax.random.normal(k_v1, (Cout, Cin, K), jnp.float32)
    g1 = 1.0 + 0.1 * jax.random.normal(k_g1, (Cout,), jnp.float32)
    v1_norm = jnp.sqrt(jnp.sum(v1 * v1, axis=(1, 2), keepdims=True)) + 1e-12
    w1 = g1[:, None, None] * v1 / v1_norm                        # (Cout, Cin, K)
    b1 = 0.05 * jax.random.normal(k_b1, (Cout,), jnp.float32)

    # downsample 1x1 conv (input_dim != output_dim): weight.normal_(0, 0.01)
    wds = 0.01 * jax.random.normal(k_wd, (Cout, Cin, 1), jnp.float32)
    bds = 0.05 * jax.random.normal(k_bd, (Cout,), jnp.float32)

    # --- small demo shape (single full-L tile path) --------------------------
    L, dilation = 16, 1
    x = jax.random.normal(k_x, (N, Cin, L), jnp.float32)
    out = temporal_block(x, w1, b1, wds, bds, kernel_size=K, dilation=dilation)
    out = jax.block_until_ready(out)
    ref = _reference(x, w1, b1, wds, bds, kernel_size=K, dilation=dilation)
    assert out.shape == (N, Cout, L)
    # bf16 MXU inputs with f32 accumulation -> loosened tolerance vs pure f32.
    assert jnp.allclose(out, ref, atol=3e-2, rtol=3e-2), "mismatch (small)"

    # --- longer sequence (exercises the L-tile + causal-halo path) -----------
    L2, dilation2 = 1024, 2
    x2 = jax.random.normal(k_x2, (N, Cin, L2), jnp.float32)
    out2 = temporal_block(x2, w1, b1, wds, bds, kernel_size=K,
                          dilation=dilation2)
    out2 = jax.block_until_ready(out2)
    ref2 = _reference(x2, w1, b1, wds, bds, kernel_size=K, dilation=dilation2)
    assert out2.shape == (N, Cout, L2)
    assert jnp.allclose(out2, ref2, atol=3e-2, rtol=3e-2), "mismatch (tiled)"

    print("KERNEL_OK")
</pallas_src>

<mosaic_0001>
module attributes {stable_mosaic.version = 11 : i64} {
  func.func @_temporal_block_kernel(%arg0: i32, %arg1: i32, %arg2: memref<1x4x16xf32, #tpu.memory_space<vmem>>, %arg3: memref<16x64xbf16, #tpu.memory_space<vmem>>, %arg4: memref<16x1xf32, #tpu.memory_space<vmem>>, %arg5: memref<1x8x16xf32, #tpu.memory_space<vmem>>, %arg6: memref<64x16xbf16, #tpu.memory_space<vmem>>) attributes {dimension_semantics = [#tpu.dimension_semantics<parallel>, #tpu.dimension_semantics<parallel>], iteration_bounds = array<i64: 2, 1>, scalar_prefetch = 0 : i64, scratch_operands = 1 : i64, tpu.core_type = #tpu.core_type<tc>, window_params = [{transform_indices = @transform_0, window_bounds = array<i64: 1, 4, 16>}, {pipeline_mode = #tpu.pipeline_mode<synchronous>, transform_indices = @transform_1, window_bounds = array<i64: 16, 64>}, {pipeline_mode = #tpu.pipeline_mode<synchronous>, transform_indices = @transform_2, window_bounds = array<i64: 16, 1>}, {transform_indices = @transform_3, window_bounds = array<i64: 1, 8, 16>}]} {
    %c0 = arith.constant 0 : index
    %c0_0 = arith.constant 0 : index
    %c0_1 = arith.constant 0 : index
    %0 = vector.load %arg2[%c0, %c0_0, %c0_1] : memref<1x4x16xf32, #tpu.memory_space<vmem>>, vector<1x4x16xf32>
    %1 = vector.shape_cast %0 : vector<1x4x16xf32> to vector<4x16xf32>
    %2 = arith.truncf %1 : vector<4x16xf32> to vector<4x16xbf16>
    %3 = vector.extract_strided_slice %2 {offsets = [0, 0], sizes = [4, 13], strides = [1, 1]} : vector<4x16xbf16> to vector<4x13xbf16>
    %c0_2 = arith.constant 0 : index
    %c3 = arith.constant 3 : index
    %4 = vector.load %arg6[%c0_2, %c3] : memref<64x16xbf16, #tpu.memory_space<vmem>>, vector<4x13xbf16>
    tpu.vector_store %arg6[%c0_2, %c3], %3 {strides = array<i32>} : memref<64x16xbf16, #tpu.memory_space<vmem>>, vector<4x13xbf16>,
    %cst = arith.constant 0.000000e+00 : bf16
    %5 = vector.broadcast %cst : bf16 to vector<4x3xbf16>
    %c0_3 = arith.constant 0 : index
    %c0_4 = arith.constant 0 : index
    %6 = vector.load %arg6[%c0_3, %c0_4] : memref<64x16xbf16, #tpu.memory_space<vmem>>, vector<4x3xbf16>
    tpu.vector_store %arg6[%c0_3, %c0_4], %5 {strides = array<i32>} : memref<64x16xbf16, #tpu.memory_space<vmem>>, vector<4x3xbf16>,
    %cst_5 = arith.constant 0.000000e+00 : bf16
    %7 = vector.broadcast %cst_5 : bf16 to vector<12x16xbf16>
    %c4 = arith.constant 4 : index
    %c0_6 = arith.constant 0 : index
    %8 = vector.load %arg6[%c4, %c0_6] : memref<64x16xbf16, #tpu.memory_space<vmem>>, vector<12x16xbf16>
    tpu.vector_store %arg6[%c4, %c0_6], %7 {strides = array<i32>} : memref<64x16xbf16, #tpu.memory_space<vmem>>, vector<12x16xbf16>,
    %9 = vector.extract_strided_slice %2 {offsets = [0, 0], sizes = [4, 14], strides = [1, 1]} : vector<4x16xbf16> to vector<4x14xbf16>
    %c16 = arith.constant 16 : index
    %c2 = arith.constant 2 : index
    %10 = vector.load %arg6[%c16, %c2] : memref<64x16xbf16, #tpu.memory_space<vmem>>, vector<4x14xbf16>
    tpu.vector_store %arg6[%c16, %c2], %9 {strides = array<i32>} : memref<64x16xbf16, #tpu.memory_space<vmem>>, vector<4x14xbf16>,
    %cst_7 = arith.constant 0.000000e+00 : bf16
    %11 = vector.broadcast %cst_7 : bf16 to vector<4x2xbf16>
    %c16_8 = arith.constant 16 : index
    %c0_9 = arith.constant 0 : index
    %12 = vector.load %arg6[%c16_8, %c0_9] : memref<64x16xbf16, #tpu.memory_space<vmem>>, vector<4x2xbf16>
    tpu.vector_store %arg6[%c16_8, %c0_9], %11 {strides = array<i32>} : memref<64x16xbf16, #tpu.memory_space<vmem>>, vector<4x2xbf16>,
    %cst_10 = arith.constant 0.000000e+00 : bf16
    %13 = vector.broadcast %cst_10 : bf16 to vector<12x16xbf16>
    %c20 = arith.constant 20 : index
    %c0_11 = arith.constant 0 : index
    %14 = vector.load %arg6[%c20, %c0_11] : memref<64x16xbf16, #tpu.memory_space<vmem>>, vector<12x16xbf16>
    tpu.vector_store %arg6[%c20, %c0_11], %13 {strides = array<i32>} : memref<64x16xbf16, #tpu.memory_space<vmem>>, vector<12x16xbf16>,
    %15 = vector.extract_strided_slice %2 {offsets = [0, 0], sizes = [4, 15], strides = [1, 1]} : vector<4x16xbf16> to vector<4x15xbf16>
    %c32 = arith.constant 32 : index
    %c1 = arith.constant 1 : index
    %16 = vector.load %arg6[%c32, %c1] : memref<64x16xbf16, #tpu.memory_space<vmem>>, vector<4x15xbf16>
    tpu.vector_store %arg6[%c32, %c1], %15 {strides = array<i32>} : memref<64x16xbf16, #tpu.memory_space<vmem>>, vector<4x15xbf16>,
    %cst_12 = arith.constant 0.000000e+00 : bf16
    %17 = vector.broadcast %cst_12 : bf16 to vector<4x1xbf16>
    %c32_13 = arith.constant 32 : index
    %c0_14 = arith.constant 0 : index
    %18 = vector.load %arg6[%c32_13, %c0_14] : memref<64x16xbf16, #tpu.memory_space<vmem>>, vector<4x1xbf16>
    tpu.vector_store %arg6[%c32_13, %c0_14], %17 {strides = array<i32>} : memref<64x16xbf16, #tpu.memory_space<vmem>>, vector<4x1xbf16>,
    %cst_15 = arith.constant 0.000000e+00 : bf16
    %19 = vector.broadcast %cst_15 : bf16 to vector<12x16xbf16>
    %c36 = arith.constant 36 : index
    %c0_16 = arith.constant 0 : index
    %20 = vector.load %arg6[%c36, %c0_16] : memref<64x16xbf16, #tpu.memory_space<vmem>>, vector<12x16xbf16>
    tpu.vector_store %arg6[%c36, %c0_16], %19 {strides = array<i32>} : memref<64x16xbf16, #tpu.memory_space<vmem>>, vector<12x16xbf16>,
    %c48 = arith.constant 48 : index
    %c0_17 = arith.constant 0 : index
    %21 = vector.load %arg6[%c48, %c0_17] : memref<64x16xbf16, #tpu.memory_space<vmem>>, vector<4x16xbf16>
    tpu.vector_store %arg6[%c48, %c0_17], %2 {strides = array<i32>} : memref<64x16xbf16, #tpu.memory_space<vmem>>, vector<4x16xbf16>,
    %cst_18 = arith.constant 0.000000e+00 : bf16
    %22 = vector.broadcast %cst_18 : bf16 to vector<12x16xbf16>
    %c52 = arith.constant 52 : index
    %c0_19 = arith.constant 0 : index
    %23 = vector.load %arg6[%c52, %c0_19] : memref<64x16xbf16, #tpu.memory_space<vmem>>, vector<12x16xbf16>
    tpu.vector_store %arg6[%c52, %c0_19], %22 {strides = array<i32>} : memref<64x16xbf16, #tpu.memory_space<vmem>>, vector<12x16xbf16>,
    %c0_20 = arith.constant 0 : index
    %c0_21 = arith.constant 0 : index
    %24 = vector.load %arg3[%c0_20, %c0_21] : memref<16x64xbf16, #tpu.memory_space<vmem>>, vector<16x64xbf16>
    %c0_22 = arith.constant 0 : index
    %c0_23 = arith.constant 0 : index
    %25 = vector.load %arg6[%c0_22, %c0_23] : memref<64x16xbf16, #tpu.memory_space<vmem>>, vector<64x16xbf16>
    %cst_24 = arith.constant dense<0.000000e+00> : vector<16x16xf32>
    %26 = tpu.matmul %24, %25, %cst_24 {dimension_numbers = #tpu.dot_dimension_numbers<[1], [0], [0], [1], [0, 0, 1, 1], [], []>} : vector<16x64xbf16>, vector<64x16xbf16>, vector<16x16xf32> -> vector<16x16xf32>
    %c0_25 = arith.constant 0 : index
    %c0_26 = arith.constant 0 : index
    %27 = vector.load %arg4[%c0_25, %c0_26] : memref<16x1xf32, #tpu.memory_space<vmem>>, vector<16x1xf32>
    %28 = vector.broadcast %27 : vector<16x1xf32> to vector<16x16xf32>
    %29 = arith.addf %26, %28 : vector<16x16xf32>
    %30 = vector.extract_strided_slice %29 {offsets = [0, 0], sizes = [8, 16], strides = [1, 1]} : vector<16x16xf32> to vector<8x16xf32>
    %31 = vector.extract_strided_slice %29 {offsets = [8, 0], sizes = [8, 16], strides = [1, 1]} : vector<16x16xf32> to vector<8x16xf32>
    %cst_27 = arith.constant 0.000000e+00 : f32
    %32 = vector.broadcast %cst_27 : f32 to vector<8x16xf32>
    %33 = arith.cmpf ogt, %30, %32 : vector<8x16xf32>
    %cst_28 = arith.constant 0.00999999977 : f32
    %34 = vector.broadcast %cst_28 : f32 to vector<8x16xf32>
    %35 = arith.mulf %34, %30 : vector<8x16xf32>
    %36 = arith.select %33, %30, %35 : vector<8x16xi1>, vector<8x16xf32>
    %37 = arith.addf %36, %31 : vector<8x16xf32>
    %cst_29 = arith.constant 0.000000e+00 : f32
    %38 = vector.broadcast %cst_29 : f32 to vector<8x16xf32>
    %39 = arith.cmpf ogt, %37, %38 : vector<8x16xf32>
    %cst_30 = arith.constant 0.00999999977 : f32
    %40 = vector.broadcast %cst_30 : f32 to vector<8x16xf32>
    %41 = arith.mulf %40, %37 : vector<8x16xf32>
    %42 = arith.select %39, %37, %41 : vector<8x16xi1>, vector<8x16xf32>
    %c0_31 = arith.constant 0 : index
    %c0_32 = arith.constant 0 : index
    %c0_33 = arith.constant 0 : index
    %43 = vector.load %arg5[%c0_31, %c0_32, %c0_33] : memref<1x8x16xf32, #tpu.memory_space<vmem>>, vector<1x8x16xf32>
    %44 = vector.shape_cast %43 : vector<1x8x16xf32> to vector<8x16xf32>
    %45 = vector.shape_cast %42 : vector<8x16xf32> to vector<1x8x16xf32>
    tpu.vector_store %arg5[%c0_31, %c0_32, %c0_33], %45 {strides = array<i32>} : memref<1x8x16xf32, #tpu.memory_space<vmem>>, vector<1x8x16xf32>,
    return
  }
  func.func @transform_0(%arg0: i32, %arg1: i32) -> (i32, i32, i32) {
    %c0_i32 = arith.constant 0 : i32
    %c0_i32_0 = arith.constant 0 : i32
    return %arg0, %c0_i32, %arg1 : i32, i32, i32
  }
  func.func @transform_1(%arg0: i32, %arg1: i32) -> (i32, i32) {
    %c0_i32 = arith.constant 0 : i32
    %c0_i32_0 = arith.constant 0 : i32
    %c0_i32_1 = arith.constant 0 : i32
    return %c0_i32, %c0_i32_0 : i32, i32
  }
  func.func @transform_2(%arg0: i32, %arg1: i32) -> (i32, i32) {
    %c0_i32 = arith.constant 0 : i32
    %c0_i32_0 = arith.constant 0 : i32
    %c0_i32_1 = arith.constant 0 : i32
    return %c0_i32, %c0_i32_0 : i32, i32
  }
  func.func @transform_3(%arg0: i32, %arg1: i32) -> (i32, i32, i32) {
    %c0_i32 = arith.constant 0 : i32
    %c0_i32_0 = arith.constant 0 : i32
    return %arg0, %c0_i32, %arg1 : i32, i32, i32
  }
}

</mosaic_0001>

<bundles_post_ra>
// kernel: tpu_custom_call.1
= control target key start
LH: loop header
LB: loop body
LE: loop exit
PB: predicated region body
PF: predicated region fallthrough
CT: control target
= control target key end

     0   :  { %8 = vsyncpa [#allocation4], 0  ;;  %s744_s0 = inlined_call_operand.vmem [shape: f32[2,4,16], index: 0, kind: input, shape index: {}]   ;;  %s745_s1 = inlined_call_operand.vmem [shape: bf16[16,64], index: 1, kind: input, shape index: {}]   ;;  %s746_s2 = inlined_call_operand.vmem [shape: f32[16,1], index: 2, kind: input, shape index: {}]   ;;  %s747_s3 = inlined_call_operand.hbm [shape: f32[2,8,16], index: 3, kind: output, shape index: {}]  }
   0x1   :  { %10 = vsyncpa [#allocation4 + $0x1], 0  ;;  %s630_s12 = smov 0   ;;  %s632_s13 = smov 0  }
   0x2   :  { %s634_s14 = smov 0   ;;  %s636_s15 = smov 0  }
   0x3   :  { %s638_s16 = smov 0   ;;  %s640_s17 = smov 0  }
   0x4 LB: > { %s421_s18 = sadd.s32 4294967295, %s601_s17   ;;  %s422_s19 = sadd.s32 4294967294, %s601_s17   ;;  %s601_s17 = sphi %s640_s17, %s16_s17   ;;  %s597_s16 = sphi %s638_s16, %s754_s16   ;;  %s593_s15 = sphi %s636_s15, %s753_s15   ;;  %s589_s14 = sphi %s634_s14, %s752_s14   ;;  %s585_s13 = sphi %s632_s13, %s751_s13   ;;  %s581_s12 = sphi %s630_s12, %s750_s12  }
   0x5   : > { %s28_s20 = sadd.s32 1, %s597_s16  ;;  %s107_s21 = sadd.s32 1, %s589_s14 }
   0x6   : > { %p30_p0 = scmp.ge.s32.totalorder %s28_s20, 2  ;;  %p117_p1 = scmp.ne.s32.totalorder %s589_s14, %s585_s13 }
   0x7   : > { %p118_p2 = scmp.eq.s32.totalorder %s421_s18, 1  ;;  %p123_p3 = scmp.ne.s32.totalorder %s585_s13, %s581_s12 }
   0x8   : > { %s756_s20 = smov (%p30_p0, %s28_s20), 0  ;;  %p124_p5 = scmp.eq.s32.totalorder %s422_s19, 1 }
   0x9   : > { %p670_p4 = por %p118_p2, %p117_p1  ;;  %s102_s23 = ssub.s32 %s597_s16, %s756_s20 }
   0xa   : > { %p425_p6 = scmp.ge.s32.totalorder %s601_s17, 1  ;;  %p105_p7 = scmp.eq.s32.totalorder %s102_s23, 0 }
   0xb   : > { %p677_p8 = por %p124_p5, %p123_p3  ;;  %p158_p9 = scmp.lt.s32.totalorder %s601_s17, 3 }
   0xc   : > { %s683_s25 = scalar_select %p105_p7, %s589_s14, %s107_s21  }
   0xd   : > { %p159_p10 = pnand %p425_p6, %p158_p9 }
   0xe   : > { %p184_p11 = scmp.lt.s32.totalorder (!%p159_p10), %s593_s15, 1  ;;  %s605_s4 = smov (!%p159_p10), 1  }
   0xf   : > { %162 = sbr.rel (%p159_p10) target bundleno = 380 (0x17c), region = 32  ;;  %s606_s5 = smov (!%p159_p10), 3  }
  0x10   : > { %s607_s6 = smov (!%p159_p10), 2   ;;  %s181_s19 = sand.u32 (!%p159_p10), 1, %s585_s13  }
  0x11   : > { %s426_s21 = sshll.u32 (!%p159_p10), %s181_s19, 3  ;;  %s436_s23 = sshll.u32 (!%p159_p10), %s593_s15, 7 }
  0x14   : > { %v603_v0 = vmov 0   ;;  %s185_s26 = scalar_select %p184_p11, %s593_s15, 1  ;;  %v604_v1 = vmov 0.0   ;;  %vm204_vm0 = vcmask 125954   ;;  %vm206_vm1 = vcmask 125952   ;;  %v240_v5 = vld [vmem:[%s746_s2] sm:$0xff] }
  0x15   : > { %518 = vset.pattern.permute.xlu1 %v603_v0  ;;  %519 = vset.pattern.permute.xlu0 %v603_v0  ;;  %228 = vst.msk [vmem:[#allocation2 + $0x18] sm:$0xc] %vm204_vm0, %v603_v0  ;;  %205 = vst.msk [vmem:[#allocation2] sm:$0xc] %vm204_vm0, %v603_v0  ;;  %vm226_vm2 = vcmask 123904   ;;  %vm608_vm3 = vmmov 0  }
  0x16   : > { %445 = vmatprep.subr.bf16.mxu0 %v604_v1  ;;  %229 = vst.msk [vmem:[#allocation2 + $0x1c] sm:$0xf] %vm206_vm1, %v603_v0  ;;  %207 = vst.msk [vmem:[#allocation2 + $0x4] sm:$0xf] %vm206_vm1, %v603_v0  ;;  %s427_s27 = sshll.u32 %s185_s26, 2  ;;  %453 = vmatprep.mubr.msk.bf16.mxu0 %vm608_vm3, %v604_v1  ;;  %v241_v6 = vld [vmem:[%s746_s2 + $0x8] sm:$0xff] }
  0x17   : > { %215 = vst.msk [vmem:[#allocation2 + $0x8] sm:$0xc] %vm204_vm0, %v603_v0  ;;  %224 = vst.msk [vmem:[#allocation2 + $0x10] sm:$0xc] %vm204_vm0, %v603_v0  ;;  %s190_s30 = scalar_lea.vmem %s744_s0, %s427_s27  ;;  %vm220_vm4 = vcmask 123912   ;;  %vm200_vm5 = vcmask 123928  }
  0x18   : > { %216 = vst.msk [vmem:[#allocation2 + $0xc] sm:$0xf] %vm206_vm1, %v603_v0  ;;  %225 = vst.msk [vmem:[#allocation2 + $0x14] sm:$0xf] %vm206_vm1, %v603_v0  ;;  %v192_v2 = vld [vmem:[%s190_s30] sm:$0xf]  ;;  %s704_s30 = scalar_lea.hbm %s747_s3, %s436_s23 }
  0x19   : > { %v193_v3 = vpack.c.bf16 %v192_v2, %v192_v2  ;;  %vm222_vm6 = vcmask 1024   ;;  %vm202_vm7 = vcmask 17408   ;;  %vm211_vm8 = vcmask 123920   ;;  %v524_v13 = vld [vmem:[%s745_s1] sm:$0xff]   ;;  %s183_s26 = scalar_lea.vmem [#allocation3], %s426_s21  ;;  %s609_s15 = smov [#allocation3]  }
  0x1a   : > { %vm213_vm9 = vcmask 9216   ;;  %vm281_vm10 = vcmask 523264   ;;  %s350_s27 = sshll.u32 %s183_s26, 4  ;;  %vm333_vm13 = vcmask 130048   ;;  %s351_s27 = int_to_ptr.vmem [resolvable:$true] %s350_s27 }
  0x1b   : > { %217 = vrot.lane.b32.xlu0 %v193_v3, %s605_s4  ;;  %227 = vst.msk [vmem:[#allocation2 + $0x18] sm:$0x3] %vm226_vm2, %v193_v3  ;;  %197 = vrot.lane.b32.xlu1 %v193_v3, %s606_s5  ;;  %s336_s4 = scalar_lea.sflag [#allocation4], %s181_s19  ;;  %s525_s5 = scalar_lea.vmem %s351_s27, 128 }
  0x1c   : > { %p526_p12 = scmp.ne.s32.totalorder %s351_s27, %s525_s5 }
  0x1e   : > { %p527_p13 = pnand %p526_p12, %p670_p4 }
  0x1f   : > { %208 = vrot.lane.b32.xlu0 %v193_v3, %s607_s6  ;;  %244 = vperm.xlu1 %518, %v240_v5   ;;  %s529_s6 = sshll.u32 %s609_s15, 4  ;;  %s530_s6 = int_to_ptr.vmem [resolvable:$false] %s529_s6 }
  0x20   : > { %p528_p0 = pneg %p527_p13  ;;  %s531_s7 = scalar_lea.vmem %s530_s6, 256 }
  0x21   : > { %p532_p1 = scmp.lt.s32.totalorder %s351_s27, %s530_s6  ;;  %p533_p2 = scmp.lt.s32.totalorder %s531_s7, %s525_s5 }
  0x22   : > { %v520_v4 = vld [vmem:[#allocation2 + $0x18] sm:$0xff]  }
  0x23   : > { %446 = vmatpush3.bf16.msra.mxu0 %v520_v4  ;;  %249 = vperm.xlu0 %519, %v241_v6   ;;  %p534_p3 = por %p533_p2, %p532_p1 }
  0x24   : > { %447 = vmatprep.subr.bf16.mxu0 %v604_v1 }
  0x25   : > { %p535_p5 = pnand %p534_p3, %p528_p0 }
  0x8d   : > { %v218_v7 = vpop.permute.xlu0 %217  ;;  %v198_v8 = vpop.permute.xlu1 %197 }
  0x8e   : > { %221 = vst.msk [vmem:[#allocation2 + $0x10] sm:$0x3] %vm220_vm4, %v218_v7 }
  0x8f   : > { %201 = vst.msk [vmem:[#allocation2] sm:$0x3] %vm200_vm5, %v198_v8 }
  0x90   : > { %223 = vst.msk [vmem:[#allocation2 + $0x10] sm:$0x3] %vm222_vm6, %v603_v0 }
  0x91   : > { %203 = vst.msk [vmem:[#allocation2] sm:$0x3] %vm202_vm7, %v603_v0  ;;  %v209_v9 = vpop.permute.xlu0 %208 }
  0x92   : > { %212 = vst.msk [vmem:[#allocation2 + $0x8] sm:$0x3] %vm211_vm8, %v209_v9 }
  0x93   : > { %214 = vst.msk [vmem:[#allocation2 + $0x8] sm:$0x3] %vm213_vm9, %v603_v0 }
  0x97   : > { %v521_v10 = vld [vmem:[#allocation2 + $0x10] sm:$0xff]  }
  0x98   : > { %448 = vmatpush3.bf16.msra.mxu0 %v521_v10  ;;  %v523_v12 = vld [vmem:[#allocation2] sm:$0xff]  }
  0x99   : > { %449 = vmatprep.subr.bf16.mxu0 %v604_v1 }
  0x9a   : > { %v522_v11 = vld [vmem:[#allocation2 + $0x8] sm:$0xff]   ;;  %v245_v14 = vpop.permute.xlu1 %244 }
  0x9c   : > { %450 = vmatpush3.bf16.msra.mxu0 %v522_v11 }
  0x9d   : > { %451 = vmatprep.subr.bf16.mxu0 %v604_v1 }
  0x9e   : > { %v250_v18 = vpop.permute.xlu0 %249 }
  0xa0   : > { %452 = vmatpush3.bf16.msra.mxu0 %v523_v12 }
  0xa3   : > { %454 = vmatmul.mubr.msk.bf16.vlgmr.msra.gmra.mxu0 %vm281_vm10, %v524_v13 }
 0x163   : > { %v319_v15 = vpop.f32.mrf.mxu0 }
 0x164   : > { %v320_v16 = vadd.f32 %v319_v15, %v245_v14 }
 0x165   : > { %v455_v17 = vpop.f32.mrf.mxu0 }
 0x166   : > { %vm326_vm11 = vcmp.gt.f32.partialorder %v320_v16, 0.0  ;;  %v327_v19 = vmul.f32 0.01, %v320_v16 }
 0x167   : > { %v322_v20 = vpop.f32.mrf.mxu0 }
 0x168   : > { %v323_v21 = vadd.f32 %v322_v20, %v250_v18  ;;  %v328_v22 = vsel %vm326_vm11, %v320_v16, %v327_v19 }
 0x169   : > { %v456_v23 = vpop.f32.mrf.mxu0 }
 0x16a   : > { %v329_v24 = vadd.f32 %v328_v22, %v323_v21 }
 0x16c   : > { %vm330_vm12 = vcmp.gt.f32.partialorder %v329_v24, 0.0  ;;  %v331_v25 = vmul.f32 0.01, %v329_v24 }
 0x16e   : > { %v332_v26 = vsel %vm330_vm12, %v329_v24, %v331_v25 }
 0x16f   : > { %334 = vst.msk [vmem:[%s183_s26] sm:$0xff] %vm333_vm13, %v332_v26 }
 0x170   : > { %538 = shalt.err (!%p535_p5)
}
 0x171   : > { %s539_s8 = scalar_lea.hbm %s704_s30, 128  ;;  %s543_s11 = scalar_lea.hbm %s747_s3, 256 }
 0x172   : > { %p540_p6 = scmp.ne.s32.totalorder %s704_s30, %s539_s8  ;;  %p544_p10 = scmp.lt.s32.totalorder %s704_s30, %s747_s3 }
 0x173   : > { %p545_p11 = scmp.lt.s32.totalorder %s543_s11, %s539_s8 }
 0x174   : > { %p541_p7 = pnand %p540_p6, %p670_p4 }
 0x175   : > { %p546_p12 = por %p545_p11, %p544_p10 }
 0x176   : > { %p542_p9 = pneg %p541_p7 }
 0x178   : > { %p547_p13 = pnand %p546_p12, %p542_p9 }
 0x17a   : > { %550 = shalt.err (!%p547_p13)
}
 0x17b   : > { %457 = dma.vmem_to_hbm [thread:$0]  (%p670_p4), %s351_s27, 128, %s704_s30, %s336_s4  }
 0x17c PF: > { %p463_p0 = scmp.ge.s32.totalorder %s601_s17, 2  ;;  %s362_s21 = sand.u32 1, %s581_s12  }
 0x17d   : > { %s363_s23 = scalar_lea.sflag [#allocation4], %s362_s21 }
 0x17e   : > { %p460_p1 = pnand %p463_p0, %p677_p8 }
 0x180   : > { %p461_p2 = pneg %p460_p1 }
 0x182   : > { %576 = dma.done.wait (%p461_p2), %s363_s23, 128  }
 0x183   : > { %578 = vsyncadd (%p461_p2), %s363_s23, 4294967168  ;;  %s16_s17 = sadd.s32 1, %s601_s17   ;;  %s750_s12 = smov %s585_s13 }
 0x184   : > { %p13_p3 = scmp.ge.s32.totalorder %s16_s17, 4   ;;  %s751_s13 = smov %s589_s14 }
 0x185   : > { %s752_s14 = smov %s683_s25  ;;  %s753_s15 = smov %s597_s16 }
 0x186   : > { %s754_s16 = smov %s756_s20  ;;  %15 = sbr.rel (!%p13_p3) target bundleno = 4 (0x4), region = 67 }
 0x18b   :  { %368 = vsyncpa [#allocation4], 1 }
 0x18c   :  { %370 = vsyncpa [#allocation4 + $0x1], 1 }

</bundles_post_ra>
